<compile_context>
chip_gen: v7x
topology: tpu7x:2x2x1
jax: 0.10.0
libtpu: 0.0.40
codegen_flags: <defaults>
</compile_context>

<pallas_src>
import jax
import jax.numpy as jnp
from jax.experimental import pallas as pl
from jax.experimental.pallas import tpu as pltpu

INPUT_SIZE = 1
OUTPUT_SIZE = 1
HIDDEN_LAYERS = 2
HIDDEN_SIZE = 32

LANE = 128        # TPU lane width
TB_MAX = 512      # max batch tile (lanes) per grid step


def _mlp_kernel(x_ref, w1_ref, w2_ref, w3_ref, b_ref, o_ref):
    """Transposed layout: features on sublanes, batch on lanes.

    x_ref  : (INPUT_SIZE, TB)
    w1_ref : (HIDDEN_SIZE, INPUT_SIZE)           -- PyTorch (out, in) layout
    w2_ref : (HIDDEN_SIZE, HIDDEN_SIZE)
    w3_ref : (OUTPUT_SIZE, HIDDEN_SIZE)
    b_ref  : (2*HIDDEN_SIZE + OUTPUT_SIZE, 1)    -- packed [b1; b2; b3]
    o_ref  : (OUTPUT_SIZE, TB)                   -- lane-dense output
    """
    x = x_ref[...]                                                 # (1, TB)
    b1 = b_ref[0:HIDDEN_SIZE, :]                                   # (H, 1)
    b2 = b_ref[HIDDEN_SIZE:2 * HIDDEN_SIZE, :]                     # (H, 1)
    b3 = b_ref[2 * HIDDEN_SIZE:2 * HIDDEN_SIZE + OUTPUT_SIZE, :]   # (1, 1)

    # Layer 1: K=1 contraction as a VPU broadcast outer product (skips MXU).
    h = w1_ref[...] * x + b1                   # (H,1)*(1,TB) -> (H, TB)
    h = jnp.maximum(h, 0.0)

    # Layer 2: MXU matmul, M=K=32, N=TB (lane-dense).
    h = jnp.dot(w2_ref[...], h, preferred_element_type=jnp.float32) + b2
    h = jnp.maximum(h, 0.0)

    # Layer 3: (OUT, H) @ (H, TB) -> (OUT, TB); store is lane-dense.
    y = jnp.dot(w3_ref[...], h, preferred_element_type=jnp.float32) + b3
    o_ref[...] = y.astype(o_ref.dtype)


def mlp_forward(x, params, tb_max=TB_MAX):
    """x: (B, INPUT_SIZE) float32. params: PyTorch-layout (out,in) weights, (out,) biases."""
    B = x.shape[0]

    # Batch tile: multiple of 128 lanes, capped at tb_max; pad batch to a tile multiple.
    tb = min(tb_max, pl.cdiv(B, LANE) * LANE)
    b_pad = pl.cdiv(B, tb) * tb
    grid = (b_pad // tb,)

    # Transpose + zero-pad so batch occupies the lane (last) dimension.
    xt = jnp.zeros((INPUT_SIZE, b_pad), jnp.float32).at[:, :B].set(x.T)

    # Pack the three biases into one column vector -> a single tiny DMA.
    b_packed = jnp.concatenate(
        [params["b1"], params["b2"], params["b3"]]).reshape(-1, 1)
    n_bias = 2 * HIDDEN_SIZE + OUTPUT_SIZE

    flops = 2 * b_pad * (HIDDEN_SIZE * INPUT_SIZE
                         + HIDDEN_SIZE * HIDDEN_SIZE
                         + HIDDEN_SIZE * OUTPUT_SIZE)
    bytes_accessed = 4 * (b_pad * (INPUT_SIZE + OUTPUT_SIZE)
                          + HIDDEN_SIZE * INPUT_SIZE
                          + HIDDEN_SIZE * HIDDEN_SIZE
                          + OUTPUT_SIZE * HIDDEN_SIZE
                          + n_bias)

    yt = pl.pallas_call(
        _mlp_kernel,
        out_shape=jax.ShapeDtypeStruct((OUTPUT_SIZE, b_pad), jnp.float32),
        grid=grid,
        in_specs=[
            pl.BlockSpec((INPUT_SIZE, tb), lambda i: (0, i)),
            pl.BlockSpec((HIDDEN_SIZE, INPUT_SIZE), lambda i: (0, 0)),
            pl.BlockSpec((HIDDEN_SIZE, HIDDEN_SIZE), lambda i: (0, 0)),
            pl.BlockSpec((OUTPUT_SIZE, HIDDEN_SIZE), lambda i: (0, 0)),
            pl.BlockSpec((n_bias, 1), lambda i: (0, 0)),
        ],
        out_specs=pl.BlockSpec((OUTPUT_SIZE, tb), lambda i: (0, i)),
        compiler_params=pltpu.CompilerParams(
            dimension_semantics=("parallel",)),
        cost_estimate=pl.CostEstimate(
            flops=flops, transcendentals=0, bytes_accessed=bytes_accessed),
    )(xt, params["w1"], params["w2"], params["w3"], b_packed)

    # Drop batch padding, return in the PyTorch (B, OUTPUT_SIZE) convention.
    return yt[:, :B].T


def init_params(key):
    """Deterministic init mimicking PyTorch nn.Linear default (+-1/sqrt(fan_in)).
    Weights kept in the PyTorch (out_features, in_features) layout."""
    def linear(key, fan_in, fan_out):
        kw, kb = jax.random.split(key)
        bound = 1.0 / jnp.sqrt(jnp.float32(fan_in))
        w = jax.random.uniform(kw, (fan_out, fan_in), jnp.float32, -bound, bound)
        b = jax.random.uniform(kb, (fan_out,), jnp.float32, -bound, bound)
        return w, b

    k1, k2, k3 = jax.random.split(key, 3)
    w1, b1 = linear(k1, INPUT_SIZE, HIDDEN_SIZE)
    w2, b2 = linear(k2, HIDDEN_SIZE, HIDDEN_SIZE)
    w3, b3 = linear(k3, HIDDEN_SIZE, OUTPUT_SIZE)
    return {"w1": w1, "b1": b1, "w2": w2, "b2": b2, "w3": w3, "b3": b3}


def mlp_reference(x, p):
    h = jnp.maximum(x @ p["w1"].T + p["b1"], 0.0)
    h = jnp.maximum(h @ p["w2"].T + p["b2"], 0.0)
    return h @ p["w3"].T + p["b3"]


if __name__ == "__main__":
    key = jax.random.PRNGKey(0)
    kx, kp, kx2 = jax.random.split(key, 3)
    params = init_params(kp)

    # Small test batch (matches the module's (B, 1) inputs).
    batch = 8
    x = jax.random.normal(kx, (batch, INPUT_SIZE), jnp.float32)
    out = jax.block_until_ready(mlp_forward(x, params))
    ref = mlp_reference(x, params)
    assert out.shape == (batch, OUTPUT_SIZE)
    assert jnp.allclose(out, ref, atol=1e-5, rtol=1e-5)

    # Also exercise the multi-block grid + padding path.
    batch2 = 1000
    x2 = jax.random.normal(kx2, (batch2, INPUT_SIZE), jnp.float32)
    out2 = jax.block_until_ready(mlp_forward(x2, params))
    ref2 = mlp_reference(x2, params)
    assert out2.shape == (batch2, OUTPUT_SIZE)
    assert jnp.allclose(out2, ref2, atol=1e-5, rtol=1e-5)

    print("KERNEL_OK")
</pallas_src>

<mosaic_0001>
module attributes {stable_mosaic.version = 11 : i64} {
  func.func @_mlp_kernel(%arg0: i32, %arg1: memref<1x128xf32, #tpu.memory_space<vmem>>, %arg2: memref<32x1xf32, #tpu.memory_space<vmem>>, %arg3: memref<32x32xf32, #tpu.memory_space<vmem>>, %arg4: memref<1x32xf32, #tpu.memory_space<vmem>>, %arg5: memref<65x1xf32, #tpu.memory_space<vmem>>, %arg6: memref<1x128xf32, #tpu.memory_space<vmem>>) attributes {dimension_semantics = [#tpu.dimension_semantics<parallel>], iteration_bounds = array<i64: 1>, scalar_prefetch = 0 : i64, scratch_operands = 0 : i64, tpu.core_type = #tpu.core_type<tc>, window_params = [{transform_indices = @transform_0, window_bounds = array<i64: 1, 128>}, {pipeline_mode = #tpu.pipeline_mode<synchronous>, transform_indices = @transform_1, window_bounds = array<i64: 32, 1>}, {pipeline_mode = #tpu.pipeline_mode<synchronous>, transform_indices = @transform_2, window_bounds = array<i64: 32, 32>}, {pipeline_mode = #tpu.pipeline_mode<synchronous>, transform_indices = @transform_3, window_bounds = array<i64: 1, 32>}, {pipeline_mode = #tpu.pipeline_mode<synchronous>, transform_indices = @transform_4, window_bounds = array<i64: 65, 1>}, {transform_indices = @transform_5, window_bounds = array<i64: 1, 128>}]} {
    %c0 = arith.constant 0 : index
    %c0_0 = arith.constant 0 : index
    %0 = vector.load %arg1[%c0, %c0_0] : memref<1x128xf32, #tpu.memory_space<vmem>>, vector<1x128xf32>
    %c0_1 = arith.constant 0 : index
    %c0_2 = arith.constant 0 : index
    %1 = vector.load %arg5[%c0_1, %c0_2] : memref<65x1xf32, #tpu.memory_space<vmem>>, vector<32x1xf32>
    %c32 = arith.constant 32 : index
    %c0_3 = arith.constant 0 : index
    %2 = vector.load %arg5[%c32, %c0_3] : memref<65x1xf32, #tpu.memory_space<vmem>>, vector<32x1xf32>
    %c64 = arith.constant 64 : index
    %c0_4 = arith.constant 0 : index
    %3 = vector.load %arg5[%c64, %c0_4] : memref<65x1xf32, #tpu.memory_space<vmem>>, vector<1x1xf32>
    %c0_5 = arith.constant 0 : index
    %c0_6 = arith.constant 0 : index
    %4 = vector.load %arg2[%c0_5, %c0_6] : memref<32x1xf32, #tpu.memory_space<vmem>>, vector<32x1xf32>
    %5 = vector.broadcast %4 : vector<32x1xf32> to vector<32x128xf32>
    %6 = vector.broadcast %0 : vector<1x128xf32> to vector<32x128xf32>
    %7 = arith.mulf %5, %6 : vector<32x128xf32>
    %8 = vector.broadcast %1 : vector<32x1xf32> to vector<32x128xf32>
    %9 = arith.addf %7, %8 : vector<32x128xf32>
    %cst = arith.constant 0.000000e+00 : f32
    %10 = vector.broadcast %cst : f32 to vector<32x128xf32>
    %11 = arith.maximumf %9, %10 : vector<32x128xf32>
    %c0_7 = arith.constant 0 : index
    %c0_8 = arith.constant 0 : index
    %12 = vector.load %arg3[%c0_7, %c0_8] : memref<32x32xf32, #tpu.memory_space<vmem>>, vector<32x32xf32>
    %cst_9 = arith.constant dense<0.000000e+00> : vector<32x128xf32>
    %13 = tpu.matmul %12, %11, %cst_9 {dimension_numbers = #tpu.dot_dimension_numbers<[1], [0], [0], [1], [0, 0, 1, 1], [], []>} : vector<32x32xf32>, vector<32x128xf32>, vector<32x128xf32> -> vector<32x128xf32>
    %14 = vector.broadcast %2 : vector<32x1xf32> to vector<32x128xf32>
    %15 = arith.addf %13, %14 : vector<32x128xf32>
    %cst_10 = arith.constant 0.000000e+00 : f32
    %16 = vector.broadcast %cst_10 : f32 to vector<32x128xf32>
    %17 = arith.maximumf %15, %16 : vector<32x128xf32>
    %c0_11 = arith.constant 0 : index
    %c0_12 = arith.constant 0 : index
    %18 = vector.load %arg4[%c0_11, %c0_12] : memref<1x32xf32, #tpu.memory_space<vmem>>, vector<1x32xf32>
    %cst_13 = arith.constant dense<0.000000e+00> : vector<1x128xf32>
    %19 = tpu.matmul %18, %17, %cst_13 {dimension_numbers = #tpu.dot_dimension_numbers<[1], [0], [0], [1], [0, 0, 1, 1], [], []>} : vector<1x32xf32>, vector<32x128xf32>, vector<1x128xf32> -> vector<1x128xf32>
    %20 = vector.broadcast %3 : vector<1x1xf32> to vector<1x128xf32>
    %21 = arith.addf %19, %20 : vector<1x128xf32>
    %c0_14 = arith.constant 0 : index
    %c0_15 = arith.constant 0 : index
    %22 = vector.load %arg6[%c0_14, %c0_15] : memref<1x128xf32, #tpu.memory_space<vmem>>, vector<1x128xf32>
    tpu.vector_store %arg6[%c0_14, %c0_15], %21 {strides = array<i32>} : memref<1x128xf32, #tpu.memory_space<vmem>>, vector<1x128xf32>,
    return
  }
  func.func @transform_0(%arg0: i32) -> (i32, i32) {
    %c0_i32 = arith.constant 0 : i32
    %c0_i32_0 = arith.constant 0 : i32
    return %c0_i32, %arg0 : i32, i32
  }
  func.func @transform_1(%arg0: i32) -> (i32, i32) {
    %c0_i32 = arith.constant 0 : i32
    %c0_i32_0 = arith.constant 0 : i32
    %c0_i32_1 = arith.constant 0 : i32
    return %c0_i32, %c0_i32_0 : i32, i32
  }
  func.func @transform_2(%arg0: i32) -> (i32, i32) {
    %c0_i32 = arith.constant 0 : i32
    %c0_i32_0 = arith.constant 0 : i32
    %c0_i32_1 = arith.constant 0 : i32
    return %c0_i32, %c0_i32_0 : i32, i32
  }
  func.func @transform_3(%arg0: i32) -> (i32, i32) {
    %c0_i32 = arith.constant 0 : i32
    %c0_i32_0 = arith.constant 0 : i32
    %c0_i32_1 = arith.constant 0 : i32
    return %c0_i32, %c0_i32_0 : i32, i32
  }
  func.func @transform_4(%arg0: i32) -> (i32, i32) {
    %c0_i32 = arith.constant 0 : i32
    %c0_i32_0 = arith.constant 0 : i32
    %c0_i32_1 = arith.constant 0 : i32
    return %c0_i32, %c0_i32_0 : i32, i32
  }
  func.func @transform_5(%arg0: i32) -> (i32, i32) {
    %c0_i32 = arith.constant 0 : i32
    %c0_i32_0 = arith.constant 0 : i32
    return %c0_i32, %arg0 : i32, i32
  }
}

</mosaic_0001>

<bundles_post_ra>
// kernel: tpu_custom_call.1
= control target key start
LH: loop header
LB: loop body
LE: loop exit
PB: predicated region body
PF: predicated region fallthrough
CT: control target
= control target key end

     0   :  { %v402_v2 = vmov 0   ;;  %s511_s0 = inlined_call_operand.vmem [shape: f32[1,128], index: 0, kind: input, shape index: {}]   ;;  %s512_s1 = inlined_call_operand.vmem [shape: f32[32,1], index: 1, kind: input, shape index: {}]   ;;  %s513_s2 = inlined_call_operand.vmem [shape: f32[32,32], index: 2, kind: input, shape index: {}]   ;;  %s514_s3 = inlined_call_operand.vmem [shape: f32[1,32], index: 3, kind: input, shape index: {}]   ;;  %s515_s4 = inlined_call_operand.vmem [shape: f32[65,1], index: 4, kind: input, shape index: {}]   ;;  %s516_s5 = inlined_call_operand.hbm [shape: f32[1,128], index: 5, kind: output, shape index: {}]  }
   0x1   :  { %v31_v0 = vld [vmem:[%s512_s1] sm:$0xff]  ;;  %377 = vset.pattern.permute.xlu1 %v402_v2  ;;  %376 = vset.pattern.permute.xlu0 %v402_v2  ;;  %v32_v3 = vld [vmem:[%s512_s1 + $0x8] sm:$0xff] }
   0x2   :  { %v22_v1 = vld [vmem:[%s515_s4] sm:$0xff]  ;;  %37 = vperm.xlu0 %376, %v31_v0   ;;  %v23_v4 = vld [vmem:[%s515_s4 + $0x8] sm:$0xff] }
   0x3   :  { %67 = vperm.xlu1 %377, %v22_v1  }
   0x4   :  { %10 = vsyncpa [#allocation3], 0  ;;  %v33_v5 = vld [vmem:[%s512_s1 + $0x10] sm:$0xff]  ;;  %v34_v6 = vld [vmem:[%s512_s1 + $0x18] sm:$0xff]  ;;  %vm117_vm0 = vcmask 261120   ;;  %v403_v41 = vmov 0.0|0.0  }
   0x5   :  { %v24_v7 = vld [vmem:[%s515_s4 + $0x10] sm:$0xff]  ;;  %v25_v8 = vld [vmem:[%s515_s4 + $0x18] sm:$0xff]  ;;  %v26_v9 = vld [vmem:[%s515_s4 + $0x20] sm:$0xff]  ;;  %365 = vmatprep.subr.bf16.mxu1 %v403_v41  ;;  %vm404_vm1 = vmmov 0   ;;  %v405_v42 = vmov 0.0   ;;  %s406_s27 = smov [#allocation2]  }
   0x6   :  { %42 = vperm.xlu0 %376, %v32_v3   ;;  %v27_v10 = vld [vmem:[%s515_s4 + $0x28] sm:$0xff]  ;;  %v28_v11 = vld [vmem:[%s515_s4 + $0x30] sm:$0xff]  ;;  %v29_v12 = vld [vmem:[%s515_s4 + $0x38] sm:$0xff]  ;;  %354 = vmatprep.mubr.msk.f32.mxu1 %vm404_vm1, %v405_v42  ;;  %s305_s28 = sshll.u32 %s406_s27, 4  ;;  %s306_s28 = int_to_ptr.vmem [resolvable:$true] %s305_s28 }
   0x7   :  { %72 = vperm.xlu1 %377, %v23_v4   ;;  %v93_v13 = vld [vmem:[%s513_s2] sm:$0xff]  ;;  %v94_v38 = vld [vmem:[%s513_s2 + $0x8] sm:$0xff]  ;;  %v95_v39 = vld [vmem:[%s513_s2 + $0x10] sm:$0xff]  ;;  %s378_s29 = scalar_lea.vmem %s306_s28, 16  ;;  %s382_s30 = scalar_lea.vmem %s306_s28, 32 }
   0x8   :  { %v30_v14 = vld [vmem:[%s515_s4 + $0x40] sm:$0x1]  ;;  %340 = vmatprep.mubr.msk.f32.mxu0 %vm117_vm0, %v93_v13  ;;  %v96_v40 = vld [vmem:[%s513_s2 + $0x18] sm:$0xff]  ;;  %p379_p0 = scmp.ne.s32.totalorder %s306_s28, %s378_s29  ;;  %p383_p1 = scmp.lt.s32.totalorder %s306_s28, %s306_s28 }
   0x9   :  { %v313_v15 = vld [vmem:[%s511_s0] ss:$0 sm:$0xff]  ;;  %p384_p2 = scmp.lt.s32.totalorder %s382_s30, %s378_s29 }
   0xa   :  { %47 = vperm.xlu0 %376, %v33_v5   ;;  %v219_v61 = vld [vmem:[%s514_s3] sm:$0x1] }
   0xb   :  { %52 = vperm.xlu1 %377, %v34_v6   ;;  %p385_p3 = por %p384_p2, %p383_p1 }
   0xd   :  { %p386_p4 = pnand %p385_p3, %p379_p0 }
   0xe   :  { %77 = vperm.xlu0 %376, %v24_v7  }
   0xf   :  { %82 = vperm.xlu1 %377, %v25_v8  }
  0x12   :  { %99 = vperm.xlu0 %376, %v26_v9  }
  0x13   :  { %104 = vperm.xlu1 %377, %v27_v10  }
  0x16   :  { %109 = vperm.xlu0 %376, %v28_v11  }
  0x17   :  { %114 = vperm.xlu1 %377, %v29_v12  }
  0x1a   :  { %222 = vperm.xlu0 %376, %v30_v14  }
  0x81   :  { %v38_v16 = vpop.permute.xlu0 %37 }
  0x82   :  { %v68_v17 = vpop.permute.xlu1 %67  ;;  %v61_v18 = vmul.f32 %v313_v15, %v38_v16 }
  0x84   :  { %v85_v21 = vadd.f32 %v68_v17, %v61_v18 }
  0x85   :  { %v43_v19 = vpop.permute.xlu0 %42 }
  0x86   :  { %v73_v20 = vpop.permute.xlu1 %72  ;;  %v62_v22 = vmul.f32 %v313_v15, %v43_v19  ;;  %v89_v26 = vmax.f32 %v85_v21, 0.0 }
  0x88   :  { %v86_v23 = vadd.f32 %v73_v20, %v62_v22 }
  0x89   :  { %v48_v24 = vpop.permute.xlu0 %47 }
  0x8a   :  { %v53_v25 = vpop.permute.xlu1 %52  ;;  %v90_v27 = vmax.f32 %v86_v23, 0.0  ;;  %v63_v28 = vmul.f32 %v313_v15, %v48_v24 }
  0x8b   :  { %v64_v29 = vmul.f32 %v313_v15, %v53_v25 }
  0x8c   :  { %v357_v30 = vpack.c.bf16 %v90_v27, %v89_v26 }
  0x8d   :  { %v78_v31 = vpop.permute.xlu0 %77 }
  0x8e   :  { %v83_v32 = vpop.permute.xlu1 %82  ;;  %v87_v33 = vadd.f32 %v78_v31, %v63_v28  ;;  %358 = vmatprep.subr.bf16.mxu0 %v357_v30 }
  0x8f   :  { %v88_v34 = vadd.f32 %v83_v32, %v64_v29  ;;  %360 = vmatpush3.bf16.msra.mxu0 %v357_v30 }
  0x90   :  { %v91_v35 = vmax.f32 %v87_v33, 0.0 }
  0x91   :  { %v92_v36 = vmax.f32 %v88_v34, 0.0  ;;  %v100_v44 = vpop.permute.xlu0 %99 }
  0x92   :  { %v105_v43 = vpop.permute.xlu1 %104 }
  0x93   :  { %v361_v37 = vpack.c.bf16 %v92_v36, %v91_v35 }
  0x95   :  { %362 = vmatprep.subr.bf16.mxu0 %v361_v37  ;;  %v110_v53 = vpop.permute.xlu0 %109 }
  0x96   :  { %364 = vmatpush3.bf16.msra.mxu0 %v361_v37  ;;  %v115_v50 = vpop.permute.xlu1 %114 }
  0x99   :  { %341 = vmatmul.mubr.msk.f32.vlgmr.msra.gmra.mrb[0].mxu0 %vm117_vm0, %v94_v38  ;;  %v223_v62 = vpop.permute.xlu0 %222 }
  0x9a   :  { %343 = vmatprep.mubr.msk.f32.mxu0 %vm117_vm0, %v95_v39 }
  0x9d   :  { %344 = vmatmul.mubr.msk.f32.gmra.mrb[2].mxu0 %vm117_vm0, %v96_v40 }
 0x16c   :  { %v342_v45 = vpop.f32.mrb[0].mxu0 }
 0x16d   :  { %v202_v46 = vadd.f32 %v342_v45, %v105_v43  ;;  %v196_v47 = vpop.f32.mrb[1].mxu0 }
 0x16e   :  { %v197_v48 = vadd.f32 %v196_v47, %v100_v44 }
 0x16f   :  { %v216_v49 = vmax.f32 %v202_v46, 0.0 }
 0x170   :  { %v215_v51 = vmax.f32 %v197_v48, 0.0  ;;  %v345_v52 = vpop.f32.mrb[2].mxu0 }
 0x171   :  { %v212_v54 = vadd.f32 %v345_v52, %v115_v50  ;;  %v206_v55 = vpop.f32.mrb[3].mxu0 }
 0x172   :  { %v207_v56 = vadd.f32 %v206_v55, %v110_v53  ;;  %v366_v57 = vpack.c.bf16 %v216_v49, %v215_v51 }
 0x173   :  { %v218_v58 = vmax.f32 %v212_v54, 0.0 }
 0x174   :  { %v217_v59 = vmax.f32 %v207_v56, 0.0  ;;  %367 = vmatpush3.bf16.msra.mxu1 %v366_v57 }
 0x175   :  { %368 = vmatprep.subr.bf16.mxu1 %v403_v41 }
 0x176   :  { %v369_v60 = vpack.c.bf16 %v218_v58, %v217_v59 }
 0x178   :  { %370 = vmatpush3.bf16.msra.mxu1 %v369_v60 }
 0x17b   :  { %355 = vmatmul.mubr.msk.f32.vlgmr.msra.gmra.mrb[0].mxu1 %vm117_vm0, %v219_v61 }
 0x24e   :  { %v294_v63 = vpop.f32.mrb[0].mxu1 }
 0x24f   :  { %v295_v0 = vadd.f32 %v294_v63, %v223_v62  ;;  %v356_v1 = vpop.f32.mrb[1].mxu1 }
 0x251   :  { %298 = vst [vmem:[#allocation2] sm:$0x1] %v295_v0 }
 0x252   :  { %389 = shalt.err (!%p386_p4)
}
 0x253   :  { %s390_s7 = scalar_lea.hbm %s516_s5, 16 }
 0x254   :  { %p391_p5 = scmp.ne.s32.totalorder %s516_s5, %s390_s7  ;;  %p394_p6 = scmp.lt.u32.totalorder %s390_s7, %s516_s5 }
 0x256   :  { %p396_p7 = pnand %p394_p6, %p391_p5 }
 0x258   :  { %399 = shalt.err (!%p396_p7)
}
 0x259   :  { %308 = dma.vmem_to_hbm [thread:$0]  %s306_s28, 16, %s516_s5, [#allocation3]  }
 0x25a   :  { %400 = dma.done.wait [#allocation3], 16  }
 0x25b   :  { %401 = vsyncadd [#allocation3], 4294967280 }
 0x25c   :  { %312 = vsyncpa [#allocation3], 1 }

</bundles_post_ra>
